<compile_context>
chip_gen: v5e
topology: v5e:2x2
jax: 0.10.0
libtpu: 0.0.40
codegen_flags: <defaults>
</compile_context>

<pallas_src>
import functools

import jax
import jax.numpy as jnp
from jax.experimental import pallas as pl
from jax.experimental.pallas import tpu as pltpu


def _add_pe_kernel(x_ref, pe_ref, o_ref):
    # x_ref/o_ref block: (bt, tn); pe_ref block: (1, tn) -> sublane broadcast.
    o_ref[...] = (x_ref[...] + pe_ref[...]).astype(o_ref.dtype)


def _make_pe_table(d_model, max_len):
    """Mirrors the PyTorch buffer construction in __init__ (f32, (max_len, D))."""
    position = jnp.arange(max_len, dtype=jnp.float32)[:, None]              # (max_len, 1)
    div_term = jnp.power(
        10000.0, -jnp.arange(0, d_model, 2, dtype=jnp.float32) / d_model)   # (D/2,)
    angles = position * div_term                                            # (max_len, D/2)
    # interleave: even columns = sin, odd columns = cos
    pe = jnp.stack([jnp.sin(angles), jnp.cos(angles)], axis=-1)             # (max_len, D/2, 2)
    return pe.reshape(max_len, d_model)


def _choose_tiles(B, N, itemsize, target_bytes=8 << 20, min_block_bytes=512 << 10):
    """Pick (bt, tn): batch rows / lane columns per grid step.

    * tn tiles the flattened L*D lane axis in multiples of 128 (preferring an
      exact divisor of N) only when an 8-row block would exceed target_bytes;
      otherwise tn == N (full last dim is always a legal block shape).
    * bt targets ~target_bytes blocks, is a multiple of 8 (or == B), keeps
      blocks >= min_block_bytes, aims for >= 4 batch steps, and prefers a
      value that divides B so the last step isn't ragged.
    """
    # ---- lane (last-dim) tile ----
    if 8 * N * itemsize <= target_bytes or N % 128 != 0:
        tn = N
    else:
        tn_max = max(128, (target_bytes // (8 * itemsize)) // 128 * 128)
        tn = min(tn_max, N)
        while tn > 128 and N % tn != 0:   # prefer exact divisor -> no ragged lane tile
            tn -= 128
    row_bytes = tn * itemsize

    # ---- batch tile ----
    if B <= 8:
        return B, tn                      # block dim == full dim is always legal
    bt_cap = max(8, min(B, (target_bytes // row_bytes) // 8 * 8))
    min_rows = ((max(8, -(-min_block_bytes // row_bytes))) + 7) // 8 * 8
    bt_steps = max(8, (-(-B // 4)) // 8 * 8)          # aim for >= 4 batch steps
    bt = min(bt_cap, max(min_rows, bt_steps), B)
    # prefer a nearby bt that divides B (avoids a ragged/masked tail block)
    for cand in range(bt, max(7, bt // 2), -8):
        if B % cand == 0:
            bt = cand
            break
    return bt, tn


@functools.partial(jax.jit, static_argnames=("max_len",), donate_argnums=(0,))
def sin_pos_embedding(x, max_len=200):
    """x: (B, L, D) float array; returns x + sinusoidal PE, same shape/dtype."""
    B, L, D = x.shape
    assert D % 2 == 0, "d_model must be even"
    assert L <= max_len, "sequence length exceeds max_len"

    N = L * D
    # Build the PE "buffer" once, slice to L, cast to x.dtype (cast-before-add,
    # matching the torch reference for low-precision x), flatten lane-dense.
    pe = _make_pe_table(D, max_len)[:L].astype(x.dtype).reshape(1, N)
    x2 = x.reshape(B, N)

    bt, tn = _choose_tiles(B, N, x.dtype.itemsize)
    grid = (pl.cdiv(B, bt), pl.cdiv(N, tn))

    # Explicit scoped-VMEM budget: double-buffered in + out blocks + pe row,
    # plus headroom; capped below v7x's 64 MiB physical VMEM per TensorCore.
    block_bytes = bt * tn * x.dtype.itemsize
    pe_bytes = tn * x.dtype.itemsize
    vmem_limit = int(min(max(4 * block_bytes + 2 * pe_bytes + (8 << 20),
                             32 << 20), 48 << 20))

    out = pl.pallas_call(
        _add_pe_kernel,
        out_shape=jax.ShapeDtypeStruct((B, N), x.dtype),
        grid_spec=pltpu.PrefetchScalarGridSpec(
            num_scalar_prefetch=0,
            grid=grid,
            in_specs=[
                pl.BlockSpec((bt, tn), lambda i, j: (i, j)),
                # Constant batch index -> PE block resident across the batch axis.
                pl.BlockSpec((1, tn), lambda i, j: (0, j)),
            ],
            out_specs=pl.BlockSpec((bt, tn), lambda i, j: (i, j)),
        ),
        # Elementwise in x: write the result into x's (donated) buffer.
        input_output_aliases={0: 0},
        compiler_params=pltpu.CompilerParams(
            dimension_semantics=("parallel", "parallel"),
            vmem_limit_bytes=vmem_limit),
    )(x2, pe)
    return out.reshape(B, L, D)


def _reference(x, max_len=200):
    """Pure-JAX reference mirroring the PyTorch module."""
    B, L, D = x.shape
    position = jnp.arange(max_len, dtype=jnp.float32)[:, None]
    div_term = jnp.power(
        10000.0, -jnp.arange(0, D, 2, dtype=jnp.float32) / D)
    pe = jnp.zeros((max_len, D), dtype=jnp.float32)
    pe = pe.at[:, 0::2].set(jnp.sin(position * div_term))
    pe = pe.at[:, 1::2].set(jnp.cos(position * div_term))
    return x + pe[None, :L, :].astype(x.dtype)


if __name__ == "__main__":
    key = jax.random.PRNGKey(0)
    B, L, D = 2, 8, 32                     # small shapes: batch=2, seq=8, d_model=32
    x = jax.random.normal(key, (B, L, D), dtype=jnp.float32)

    ref = _reference(x)                    # compute before x's buffer is donated
    out = sin_pos_embedding(x)
    out = jax.block_until_ready(out)

    assert out.shape == ref.shape and out.dtype == ref.dtype
    assert jnp.allclose(out, ref, atol=1e-5, rtol=1e-5), "mismatch vs reference"

    print("KERNEL_OK")
</pallas_src>

<mosaic_0001>
module attributes {stable_mosaic.version = 11 : i64} {
  func.func @_add_pe_kernel(%arg0: i32, %arg1: i32, %arg2: memref<2x256xf32, #tpu.memory_space<vmem>>, %arg3: memref<1x256xf32, #tpu.memory_space<vmem>>, %arg4: memref<2x256xf32, #tpu.memory_space<vmem>>) attributes {dimension_semantics = [#tpu.dimension_semantics<parallel>, #tpu.dimension_semantics<parallel>], iteration_bounds = array<i64: 1, 1>, scalar_prefetch = 0 : i64, scratch_operands = 0 : i64, tpu.core_type = #tpu.core_type<tc>, window_params = [{transform_indices = @transform_0, window_bounds = array<i64: 2, 256>}, {transform_indices = @transform_1, window_bounds = array<i64: 1, 256>}, {transform_indices = @transform_2, window_bounds = array<i64: 2, 256>}]} {
    %c0 = arith.constant 0 : index
    %c0_0 = arith.constant 0 : index
    %0 = vector.load %arg2[%c0, %c0_0] : memref<2x256xf32, #tpu.memory_space<vmem>>, vector<2x256xf32>
    %c0_1 = arith.constant 0 : index
    %c0_2 = arith.constant 0 : index
    %1 = vector.load %arg3[%c0_1, %c0_2] : memref<1x256xf32, #tpu.memory_space<vmem>>, vector<1x256xf32>
    %2 = vector.broadcast %1 : vector<1x256xf32> to vector<2x256xf32>
    %3 = arith.addf %0, %2 : vector<2x256xf32>
    %c0_3 = arith.constant 0 : index
    %c0_4 = arith.constant 0 : index
    %4 = vector.load %arg4[%c0_3, %c0_4] : memref<2x256xf32, #tpu.memory_space<vmem>>, vector<2x256xf32>
    tpu.vector_store %arg4[%c0_3, %c0_4], %3 {strides = array<i32>} : memref<2x256xf32, #tpu.memory_space<vmem>>, vector<2x256xf32>,
    return
  }
  func.func @transform_0(%arg0: i32, %arg1: i32) -> (i32, i32) {
    %c0_i32 = arith.constant 0 : i32
    return %arg0, %arg1 : i32, i32
  }
  func.func @transform_1(%arg0: i32, %arg1: i32) -> (i32, i32) {
    %c0_i32 = arith.constant 0 : i32
    %c0_i32_0 = arith.constant 0 : i32
    return %c0_i32, %arg1 : i32, i32
  }
  func.func @transform_2(%arg0: i32, %arg1: i32) -> (i32, i32) {
    %c0_i32 = arith.constant 0 : i32
    return %arg0, %arg1 : i32, i32
  }
}

</mosaic_0001>

<bundles_post_ra>
// kernel: sin_pos_embedding.1
= control target key start
LH: loop header
LB: loop body
LE: loop exit
PB: predicated region body
PF: predicated region fallthrough
CT: control target
= control target key end

     0   :  { %vm17_vm0 = vcmask 1041408   ;;  %s50_s1 = inlined_call_operand.vmem [shape: f32[1,256], index: 1, kind: input, shape index: {}]   ;;  %s51_s0 = inlined_call_operand.vmem [shape: f32[2,256], index: 0, kind: input, shape index: {}, may-alias: {0,2}]   ;;  %s52_s2 = inlined_call_operand.vmem [shape: f32[2,256], index: 2, kind: output, shape index: {}, may-alias: {0,2}]  }
   0x1   :  { %v12_v0 = vld [vmem:[%s50_s1] sm:$0x3] }
   0x2   :  { %v14_v1 = vperm.slane %v12_v0, 0  ;;  %v15_v2 = vperm.slane %v12_v0, 1  ;;  %v11_v3 = vld [vmem:[%s51_s0] sm:$0xf] }
   0x4   :  { %v16_v4 = vrot.slane %v15_v2, 6 }
   0x6   :  { %v18_v5 = vsel %vm17_vm0, %v14_v1, %v16_v4 }
   0x7   :  { %v20_v6 = vadd.f32 %v18_v5, %v11_v3 }
   0x9   :  { %21 = vst [vmem:[%s52_s2] sm:$0xf] %v20_v6 }

</bundles_post_ra>
